<compile_context>
chip_gen: v5e
topology: v5e:2x2
jax: 0.10.0
libtpu: 0.0.40
codegen_flags: <defaults>
</compile_context>

<pallas_src>
import math

import jax
import jax.numpy as jnp
from jax.experimental import pallas as pl
from jax.experimental.pallas import tpu as pltpu


_LANES = 512                      # lane-dense last dim (4 x 128 lanes)
_TILE_BYTES = 6 * 1024 * 1024     # ~6 MiB per tile -> 24 MiB live VMEM (2 in + 2 out)
_VMEM_LIMIT_BYTES = 48 << 20      # explicit scoped-VMEM limit; safe on v5e/v6e/v7x
_MIN_PALLAS_BYTES = 1 << 20       # below ~1 MiB the Pallas launch overhead dominates


def _scale_kernel(factor_ref, x_ref, o_ref):
    # factor_ref: (1, 1) f32 in SMEM; x_ref / o_ref: (tm, _LANES) VMEM tiles.
    # f32 compute keeps v5e (no bf16 VPU) correct; the cast is a no-op for f32.
    o_ref[...] = (x_ref[...].astype(jnp.float32) * factor_ref[0, 0]).astype(o_ref.dtype)


def _choose_tile_rows(rows: int, granule: int, target_rows: int) -> int:
    """Tile row count: multiple of the sublane granule, or == rows for tiny slabs."""
    if rows <= granule:
        return rows                                  # single full-extent block
    target = max(granule, (target_rows // granule) * granule)
    # Prefer >= 4 grid steps (>= 2 per v7x TensorCore), else >= 2 steps, so the
    # double-buffered DMA pipeline has work to overlap on every core.
    for denom in (4, 2):
        chunk = (rows // denom // granule) * granule
        if chunk >= granule:
            return min(target, chunk)
    return granule


def scale_pallas(x: jax.Array, factor, *, min_pallas_bytes: int = _MIN_PALLAS_BYTES):
    """Multiply x by a runtime scalar `factor` (streamed through a Pallas kernel)."""
    orig_shape = x.shape
    dtype = x.dtype
    n = math.prod(orig_shape) if orig_shape else 1
    dtype_bytes = jnp.dtype(dtype).itemsize

    factor = jnp.asarray(factor, jnp.float32)

    if not jnp.issubdtype(dtype, jnp.floating):
        # PyTorch promotes integer tensors to float when scaled by a float scalar.
        return factor * x.astype(jnp.float32)

    if n == 0 or n % _LANES != 0 or n * dtype_bytes < min_pallas_bytes:
        # Ragged or tiny inputs: XLA's fused scalar multiply is already at the
        # HBM roofline and avoids any wrapper-side pad/slice copies.
        return (factor * x.astype(jnp.float32)).astype(dtype)

    # Lane-dense slab: no padding needed (n is a multiple of _LANES).
    rows = n // _LANES
    granule = max(8, 32 // dtype_bytes)               # 8 f32, 16 bf16, 32 int8/fp8
    target_rows = max(granule, _TILE_BYTES // (_LANES * dtype_bytes))
    tm = _choose_tile_rows(rows, granule, target_rows)
    grid = (pl.cdiv(rows, tm),)                       # partial last block is fine

    x2d = x.reshape(rows, _LANES)
    factor_smem = factor.reshape(1, 1)

    out2d = pl.pallas_call(
        _scale_kernel,
        out_shape=jax.ShapeDtypeStruct((rows, _LANES), dtype),
        grid_spec=pltpu.PrefetchScalarGridSpec(
            num_scalar_prefetch=0,
            grid=grid,
            in_specs=[
                pl.BlockSpec(memory_space=pltpu.MemorySpace.SMEM),  # factor scalar
                pl.BlockSpec((tm, _LANES), lambda i: (i, 0)),       # x tile
            ],
            out_specs=pl.BlockSpec((tm, _LANES), lambda i: (i, 0)),
        ),
        compiler_params=pltpu.CompilerParams(
            dimension_semantics=("parallel",),
            vmem_limit_bytes=_VMEM_LIMIT_BYTES,
        ),
        # Output reuses the input slab: pure in-place streamer.
        input_output_aliases={1: 0},
        cost_estimate=pl.CostEstimate(
            flops=n,
            transcendentals=0,
            bytes_accessed=2 * n * dtype_bytes,
        ),
    )(factor_smem, x2d)

    return out2d.reshape(orig_shape)


class ScalePallas:
    """JAX/Pallas port of the PyTorch Scale augmentation."""

    def __init__(self, max_factor: int = 5, min_pallas_bytes: int = _MIN_PALLAS_BYTES):
        self.factor_range = max_factor * 10  # randint upper bound (exclusive)
        self.min_pallas_bytes = min_pallas_bytes

    def __call__(self, x: jax.Array, key: jax.Array) -> jax.Array:
        # factor = randint(0, max_factor*10) / 10, matching np.random.randint
        # semantics (host-side RNG replaced by an explicit JAX PRNG key).
        factor_int = jax.random.randint(key, (), 0, self.factor_range)
        factor = factor_int.astype(jnp.float32) / 10.0
        return scale_pallas(x, factor, min_pallas_bytes=self.min_pallas_bytes)


if __name__ == "__main__":
    key = jax.random.PRNGKey(0)
    k_data, k_factor = jax.random.split(key)

    # Factor drawn exactly like the PyTorch module: randint(0, 50) / 10.
    factor_int = jax.random.randint(k_factor, (), 0, 50)
    factor = factor_int.astype(jnp.float32) / 10.0

    # Small NCHW-like input (512-aligned); force it through the Pallas path.
    x = jax.random.normal(k_data, (2, 4, 16, 16), dtype=jnp.float32)
    out = jax.block_until_ready(scale_pallas(x, factor, min_pallas_bytes=0))
    ref = factor * x
    assert out.shape == x.shape and out.dtype == x.dtype
    assert jnp.allclose(out, ref, atol=1e-6, rtol=1e-6)

    # Larger slab exercises the multi-tile grid path through the module wrapper.
    module = ScalePallas(max_factor=5)
    x_big = jax.random.normal(k_data, (8, 12, 4096), dtype=jnp.float32)  # 1.5 MiB
    out_big = jax.block_until_ready(module(x_big, k_factor))
    ref_big = factor * x_big
    assert out_big.shape == x_big.shape and out_big.dtype == x_big.dtype
    assert jnp.allclose(out_big, ref_big, atol=1e-6, rtol=1e-6)

    print("KERNEL_OK")
</pallas_src>

<mosaic_0001>
module attributes {stable_mosaic.version = 11 : i64} {
  func.func @_scale_kernel(%arg0: i32, %arg1: memref<1x1xf32, #tpu.memory_space<smem>>, %arg2: memref<4x512xf32, #tpu.memory_space<vmem>>, %arg3: memref<4x512xf32, #tpu.memory_space<vmem>>) attributes {dimension_semantics = [#tpu.dimension_semantics<parallel>], iteration_bounds = array<i64: 1>, scalar_prefetch = 0 : i64, scratch_operands = 0 : i64, tpu.core_type = #tpu.core_type<tc>, window_params = [{transform_indices = @transform_0, window_bounds = array<i64: 1, 1>}, {transform_indices = @transform_1, window_bounds = array<i64: 4, 512>}, {transform_indices = @transform_2, window_bounds = array<i64: 4, 512>}]} {
    %c0 = arith.constant 0 : index
    %c0_0 = arith.constant 0 : index
    %0 = vector.load %arg2[%c0, %c0_0] : memref<4x512xf32, #tpu.memory_space<vmem>>, vector<4x512xf32>
    %c0_1 = arith.constant 0 : index
    %c0_2 = arith.constant 0 : index
    %1 = memref.load %arg1[%c0_1, %c0_2] : memref<1x1xf32, #tpu.memory_space<smem>>
    %2 = vector.broadcast %1 : f32 to vector<4x512xf32>
    %3 = arith.mulf %0, %2 : vector<4x512xf32>
    %c0_3 = arith.constant 0 : index
    %c0_4 = arith.constant 0 : index
    %4 = vector.load %arg3[%c0_3, %c0_4] : memref<4x512xf32, #tpu.memory_space<vmem>>, vector<4x512xf32>
    tpu.vector_store %arg3[%c0_3, %c0_4], %3 {strides = array<i32>} : memref<4x512xf32, #tpu.memory_space<vmem>>, vector<4x512xf32>,
    return
  }
  func.func @transform_0(%arg0: i32) -> (i32, i32) {
    %c0_i32 = arith.constant 0 : i32
    %c0_i32_0 = arith.constant 0 : i32
    %c0_i32_1 = arith.constant 0 : i32
    return %c0_i32, %c0_i32_0 : i32, i32
  }
  func.func @transform_1(%arg0: i32) -> (i32, i32) {
    %c0_i32 = arith.constant 0 : i32
    %c0_i32_0 = arith.constant 0 : i32
    return %arg0, %c0_i32 : i32, i32
  }
  func.func @transform_2(%arg0: i32) -> (i32, i32) {
    %c0_i32 = arith.constant 0 : i32
    %c0_i32_0 = arith.constant 0 : i32
    return %arg0, %c0_i32 : i32, i32
  }
}

</mosaic_0001>

<bundles_post_ra>
// kernel: tpu_custom_call.1
= control target key start
LH: loop header
LB: loop body
LE: loop exit
PB: predicated region body
PF: predicated region fallthrough
CT: control target
= control target key end

     0   :  { %8 = vsyncpa [#allocation4], 0  ;;  %s132_s0 = inlined_call_operand.<no memory space> [shape: f32[1,1], index: 0, kind: input, shape index: {}]   ;;  %s133_s1 = inlined_call_operand.hbm [shape: f32[4,512], index: 1, kind: input, shape index: {}, may-alias: {1,2}]   ;;  %s134_s2 = inlined_call_operand.hbm [shape: f32[4,512], index: 2, kind: output, shape index: {}, may-alias: {1,2}]  }
   0x1   :  { %9 = vsyncpa [#allocation5], 0  ;;  %s17_s11 = sshll.u32 %s133_s1, 4  ;;  %s106_s12 = smov [#allocation3]   ;;  %s18_s11 = int_to_ptr.hbm [resolvable:$true] %s17_s11 }
   0x2   :  { %s19_s13 = sshll.u32 %s106_s12, 4  ;;  %s20_s13 = int_to_ptr.vmem [resolvable:$true] %s19_s13 }
   0x3   :  { %22 = dma.hbm_to_vmem [thread:$0]  %s18_s11, 256, %s20_s13, [#allocation4]  }
   0x4   :  { %102 = dma.done.wait [#allocation4], 256  }
   0x5   :  { %103 = vsyncadd [#allocation4], 4294967040  ;;  %v30_v0 = vstv %s132_s0  ;;  %s107_s16 = smov [#allocation6]   ;;  %s42_s20 = sshll.u32 %s134_s2, 4  ;;  %v27_v1 = vld [vmem:[#allocation3] sm:$0xff]  ;;  %v28_v2 = vld [vmem:[#allocation3 + $0x8] sm:$0xff]  ;;  %s43_s20 = int_to_ptr.hbm [resolvable:$true] %s42_s20 }
   0x6   :  { %s40_s17 = sshll.u32 %s107_s16, 4  ;;  %v31_v3 = vmul.f32 %v30_v0, %v27_v1  ;;  %v32_v4 = vmul.f32 %v30_v0, %v28_v2  ;;  %s41_s17 = int_to_ptr.vmem [resolvable:$true] %s40_s17 }
   0x8   :  { %33 = vst [vmem:[#allocation6] sm:$0xff] %v31_v3 }
   0x9   :  { %34 = vst [vmem:[#allocation6 + $0x8] sm:$0xff] %v32_v4 }
   0xa   :  { %45 = dma.vmem_to_hbm [thread:$0]  %s41_s17, 256, %s43_s20, [#allocation5]  }
   0xb   :  { %104 = dma.done.wait [#allocation5], 256  }
   0xc   :  { %105 = vsyncadd [#allocation5], 4294967040 }
   0xd   :  { %50 = vsyncpa [#allocation4], 1 }
   0xe   :  { %51 = vsyncpa [#allocation5], 1 }

</bundles_post_ra>
